<compile_context>
chip_gen: v6e
topology: v6e:2x2x1
jax: 0.10.0
libtpu: 0.0.40
codegen_flags: <defaults>
</compile_context>

<pallas_src>
import jax
import jax.numpy as jnp
from jax.experimental import pallas as pl
from jax.experimental.pallas import tpu as pltpu

BN_EPS = 1e-5


def _round_up(x, m):
    return (x + m - 1) // m * m


def _pad_to(a, shape):
    pads = [(0, s - d) for d, s in zip(a.shape, shape)]
    return jnp.pad(a, pads)


# --------------------------------------------------------------------------------------
# Kernel 1: h = x @ W1 + b1   (tiled matmul, bf16 operands, f32 accumulate)
# grid = (batch tiles, hidden tiles, K=in_c tiles); K innermost ("arbitrary").
# --------------------------------------------------------------------------------------
def linear_bias_kernel(x_ref, w_ref, b_ref, o_ref, acc_ref):
    k = pl.program_id(2)

    @pl.when(k == 0)
    def _():
        acc_ref[...] = jnp.zeros_like(acc_ref)

    acc_ref[...] += jnp.dot(x_ref[...], w_ref[...], preferred_element_type=jnp.float32)

    @pl.when(k == pl.num_programs(2) - 1)
    def _():
        o_ref[...] = (acc_ref[...] + b_ref[...]).astype(o_ref.dtype)


# --------------------------------------------------------------------------------------
# Kernel 2: out = relu(h * scale + shift) @ W2 + b2
# BN folded into a single FMA (scale/shift precomputed per feature); post-ReLU activations
# are cast to bf16 for the MXU; accumulation in f32.
# grid = (batch tiles, out tiles, K=hidden tiles); K innermost ("arbitrary").
# --------------------------------------------------------------------------------------
def bn_relu_linear_kernel(h_ref, scale_ref, shift_ref, w_ref, b_ref, o_ref, acc_ref):
    k = pl.program_id(2)

    @pl.when(k == 0)
    def _():
        acc_ref[...] = jnp.zeros_like(acc_ref)

    a = jnp.maximum(h_ref[...] * scale_ref[...] + shift_ref[...], 0.0)  # f32 VPU
    acc_ref[...] += jnp.dot(a.astype(w_ref.dtype), w_ref[...],
                            preferred_element_type=jnp.float32)

    @pl.when(k == pl.num_programs(2) - 1)
    def _():
        o_ref[...] = (acc_ref[...] + b_ref[...]).astype(o_ref.dtype)


def _vmem_limit(block_bytes, scratch_bytes):
    # BlockSpec double-buffers every in/out block; add scratch + headroom.
    return max(2 * int(sum(block_bytes)) + int(scratch_bytes) + (2 << 20), 8 << 20)


def mlp_head_forward(x, params, *, tile_m=128, compute_dtype=jnp.bfloat16):
    """Forward pass of MLPHead. x: (N, in_c) f32. Returns (N, out) f32."""
    w1, b1, gamma, beta, w2, b2 = params
    n, in_c = x.shape
    hidden = w1.shape[1]
    out_size = w2.shape[1]

    # ---- tile / padding geometry (lane = 128, f32 sublane = 8) ----
    tm = min(tile_m, _round_up(n, 8))
    n_p = _round_up(n, tm)
    tk1 = min(512, _round_up(in_c, 128))          # K tile for matmul 1
    k_p = _round_up(in_c, tk1)
    th = min(128, _round_up(hidden, 128))         # hidden tile (N-dim of mm1, K-dim of mm2)
    h_p = _round_up(hidden, th)
    to = min(128, _round_up(out_size, 128))       # out tile
    o_p = _round_up(out_size, to)

    # ---- pad + cast operands (zero padding is exact: padded rows/cols contribute 0) ----
    x_p = _pad_to(x, (n_p, k_p)).astype(compute_dtype)
    w1_p = _pad_to(w1, (k_p, h_p)).astype(compute_dtype)
    b1_p = _pad_to(b1.reshape(1, -1), (1, h_p)).astype(jnp.float32)
    g_p = _pad_to(gamma.reshape(1, -1), (1, h_p)).astype(jnp.float32)
    be_p = _pad_to(beta.reshape(1, -1), (1, h_p)).astype(jnp.float32)
    w2_p = _pad_to(w2, (h_p, o_p)).astype(compute_dtype)
    b2_p = _pad_to(b2.reshape(1, -1), (1, o_p)).astype(jnp.float32)

    itemsize = jnp.dtype(compute_dtype).itemsize

    # ---- pass 1: h = x @ W1 + b1 (f32 output, kept in f32 for exact BN statistics) ----
    vmem1 = _vmem_limit(
        [tm * tk1 * itemsize, tk1 * th * itemsize, th * 4, tm * th * 4],
        tm * th * 4)
    h = pl.pallas_call(
        linear_bias_kernel,
        out_shape=jax.ShapeDtypeStruct((n_p, h_p), jnp.float32),
        grid_spec=pltpu.PrefetchScalarGridSpec(
            num_scalar_prefetch=0,
            grid=(n_p // tm, h_p // th, k_p // tk1),
            in_specs=[
                pl.BlockSpec((tm, tk1), lambda i, j, k: (i, k)),
                pl.BlockSpec((tk1, th), lambda i, j, k: (k, j)),
                pl.BlockSpec((1, th), lambda i, j, k: (0, j)),
            ],
            out_specs=pl.BlockSpec((tm, th), lambda i, j, k: (i, j)),
            scratch_shapes=[pltpu.VMEM((tm, th), jnp.float32)],
        ),
        compiler_params=pltpu.CompilerParams(
            dimension_semantics=("parallel", "parallel", "arbitrary"),
            vmem_limit_bytes=vmem1),
    )(x_p, w1_p, b1_p)

    # ---- batch statistics over the FULL real batch (tiny reduction between calls),
    #      folded into a single per-feature scale/shift FMA ----
    h_real = h[:n, :]
    mean = jnp.mean(h_real, axis=0, keepdims=True)
    var = jnp.maximum(
        jnp.mean(jnp.square(h_real), axis=0, keepdims=True) - jnp.square(mean), 0.0)
    scale = g_p * jax.lax.rsqrt(var + BN_EPS)         # (1, h_p) f32
    shift = be_p - mean * scale                       # (1, h_p) f32

    # ---- pass 2: out = relu(h * scale + shift) @ W2 + b2 ----
    vmem2 = _vmem_limit(
        [tm * th * 4, th * 4, th * 4, th * to * itemsize, to * 4, tm * to * 4],
        tm * to * 4)
    out_pad = pl.pallas_call(
        bn_relu_linear_kernel,
        out_shape=jax.ShapeDtypeStruct((n_p, o_p), jnp.float32),
        grid_spec=pltpu.PrefetchScalarGridSpec(
            num_scalar_prefetch=0,
            grid=(n_p // tm, o_p // to, h_p // th),
            in_specs=[
                pl.BlockSpec((tm, th), lambda i, j, k: (i, k)),
                pl.BlockSpec((1, th), lambda i, j, k: (0, k)),
                pl.BlockSpec((1, th), lambda i, j, k: (0, k)),
                pl.BlockSpec((th, to), lambda i, j, k: (k, j)),
                pl.BlockSpec((1, to), lambda i, j, k: (0, j)),
            ],
            out_specs=pl.BlockSpec((tm, to), lambda i, j, k: (i, j)),
            scratch_shapes=[pltpu.VMEM((tm, to), jnp.float32)],
        ),
        compiler_params=pltpu.CompilerParams(
            dimension_semantics=("parallel", "parallel", "arbitrary"),
            vmem_limit_bytes=vmem2),
    )(h, scale, shift, w2_p, b2_p)

    return out_pad[:n, :out_size]


def init_mlp_head_params(key, in_channels, hidden_size, out_size):
    """Deterministic init mirroring PyTorch defaults (U(-1/sqrt(fan_in), 1/sqrt(fan_in)))."""
    k1, k2, k3, k4 = jax.random.split(key, 4)
    lim1 = 1.0 / jnp.sqrt(in_channels)
    lim2 = 1.0 / jnp.sqrt(hidden_size)
    w1 = jax.random.uniform(k1, (in_channels, hidden_size), jnp.float32, -lim1, lim1)
    b1 = jax.random.uniform(k2, (1, hidden_size), jnp.float32, -lim1, lim1)
    gamma = jnp.ones((1, hidden_size), jnp.float32)   # BatchNorm1d weight init
    beta = jnp.zeros((1, hidden_size), jnp.float32)   # BatchNorm1d bias init
    w2 = jax.random.uniform(k3, (hidden_size, out_size), jnp.float32, -lim2, lim2)
    b2 = jax.random.uniform(k4, (1, out_size), jnp.float32, -lim2, lim2)
    return (w1, b1, gamma, beta, w2, b2)


def mlp_head_ref(x, params, compute_dtype=jnp.bfloat16):
    """Pure-JAX reference mirroring the kernel's bf16-operand / f32-accumulate matmuls."""
    w1, b1, gamma, beta, w2, b2 = params
    h = jnp.dot(x.astype(compute_dtype), w1.astype(compute_dtype),
                preferred_element_type=jnp.float32) + b1
    mean = jnp.mean(h, axis=0, keepdims=True)
    var = jnp.maximum(jnp.mean(jnp.square(h), axis=0, keepdims=True) - jnp.square(mean), 0.0)
    scale = gamma * jax.lax.rsqrt(var + BN_EPS)
    shift = beta - mean * scale
    a = jnp.maximum(h * scale + shift, 0.0)
    return jnp.dot(a.astype(compute_dtype), w2.astype(compute_dtype),
                   preferred_element_type=jnp.float32) + b2


if __name__ == "__main__":
    # Small shapes consistent with MLPHead(in_channels, hidden_size, out_size)
    batch, in_channels, hidden_size, out_size = 8, 32, 64, 16

    key = jax.random.PRNGKey(0)
    kx, kp = jax.random.split(key)
    x = jax.random.normal(kx, (batch, in_channels), jnp.float32)
    params = init_mlp_head_params(kp, in_channels, hidden_size, out_size)

    out = mlp_head_forward(x, params)
    out = jax.block_until_ready(out)

    ref = mlp_head_ref(x, params)
    assert out.shape == (batch, out_size)
    # bf16 MXU operands (f32 accumulate) -> tolerance widened vs pure-f32.
    assert jnp.allclose(out, ref, atol=1e-2, rtol=1e-2), "mismatch vs reference"

    # TODO(synk): BatchNorm1d running_mean/running_var (momentum buffers) are not updated;
    # only training-mode batch statistics are used, matching the module's forward output.
    print("KERNEL_OK")
</pallas_src>

<mosaic_0001>
module attributes {stable_mosaic.version = 11 : i64} {
  func.func @linear_bias_kernel(%arg0: i32, %arg1: i32, %arg2: i32, %arg3: memref<8x128xbf16, #tpu.memory_space<vmem>>, %arg4: memref<128x128xbf16, #tpu.memory_space<vmem>>, %arg5: memref<1x128xf32, #tpu.memory_space<vmem>>, %arg6: memref<8x128xf32, #tpu.memory_space<vmem>>, %arg7: memref<8x128xf32, #tpu.memory_space<vmem>>) attributes {dimension_semantics = [#tpu.dimension_semantics<parallel>, #tpu.dimension_semantics<parallel>, #tpu.dimension_semantics<arbitrary>], iteration_bounds = array<i64: 1, 1, 1>, scalar_prefetch = 0 : i64, scratch_operands = 1 : i64, tpu.core_type = #tpu.core_type<tc>, window_params = [{transform_indices = @transform_0, window_bounds = array<i64: 8, 128>}, {transform_indices = @transform_1, window_bounds = array<i64: 128, 128>}, {transform_indices = @transform_2, window_bounds = array<i64: 1, 128>}, {transform_indices = @transform_3, window_bounds = array<i64: 8, 128>}]} {
    %c0_i32 = arith.constant 0 : i32
    %0 = arith.cmpi eq, %arg2, %c0_i32 : i32
    %1 = arith.extui %0 : i1 to i32
    %c0_i32_0 = arith.constant 0 : i32
    %2 = arith.cmpi ne, %1, %c0_i32_0 : i32
    scf.if %2 {
      %cst_10 = arith.constant 0.000000e+00 : f32
      %12 = vector.broadcast %cst_10 : f32 to vector<8x128xf32>
      %c0_11 = arith.constant 0 : index
      %c0_12 = arith.constant 0 : index
      %13 = vector.load %arg7[%c0_11, %c0_12] : memref<8x128xf32, #tpu.memory_space<vmem>>, vector<8x128xf32>
      tpu.vector_store %arg7[%c0_11, %c0_12], %12 {strides = array<i32>} : memref<8x128xf32, #tpu.memory_space<vmem>>, vector<8x128xf32>,
    } else {
    }
    %c0 = arith.constant 0 : index
    %c0_1 = arith.constant 0 : index
    %3 = vector.load %arg7[%c0, %c0_1] : memref<8x128xf32, #tpu.memory_space<vmem>>, vector<8x128xf32>
    %c0_2 = arith.constant 0 : index
    %c0_3 = arith.constant 0 : index
    %4 = vector.load %arg3[%c0_2, %c0_3] : memref<8x128xbf16, #tpu.memory_space<vmem>>, vector<8x128xbf16>
    %c0_4 = arith.constant 0 : index
    %c0_5 = arith.constant 0 : index
    %5 = vector.load %arg4[%c0_4, %c0_5] : memref<128x128xbf16, #tpu.memory_space<vmem>>, vector<128x128xbf16>
    %cst = arith.constant dense<0.000000e+00> : vector<8x128xf32>
    %6 = tpu.matmul %4, %5, %cst {dimension_numbers = #tpu.dot_dimension_numbers<[1], [0], [0], [1], [0, 0, 1, 1], [], []>} : vector<8x128xbf16>, vector<128x128xbf16>, vector<8x128xf32> -> vector<8x128xf32>
    %7 = arith.addf %3, %6 : vector<8x128xf32>
    %c0_6 = arith.constant 0 : index
    %c0_7 = arith.constant 0 : index
    %8 = vector.load %arg7[%c0_6, %c0_7] : memref<8x128xf32, #tpu.memory_space<vmem>>, vector<8x128xf32>
    tpu.vector_store %arg7[%c0_6, %c0_7], %7 {strides = array<i32>} : memref<8x128xf32, #tpu.memory_space<vmem>>, vector<8x128xf32>,
    %c0_i32_8 = arith.constant 0 : i32
    %9 = arith.cmpi eq, %arg2, %c0_i32_8 : i32
    %10 = arith.extui %9 : i1 to i32
    %c0_i32_9 = arith.constant 0 : i32
    %11 = arith.cmpi ne, %10, %c0_i32_9 : i32
    scf.if %11 {
      %c0_10 = arith.constant 0 : index
      %c0_11 = arith.constant 0 : index
      %12 = vector.load %arg7[%c0_10, %c0_11] : memref<8x128xf32, #tpu.memory_space<vmem>>, vector<8x128xf32>
      %c0_12 = arith.constant 0 : index
      %c0_13 = arith.constant 0 : index
      %13 = vector.load %arg5[%c0_12, %c0_13] : memref<1x128xf32, #tpu.memory_space<vmem>>, vector<1x128xf32>
      %14 = vector.broadcast %13 : vector<1x128xf32> to vector<8x128xf32>
      %15 = arith.addf %12, %14 : vector<8x128xf32>
      %c0_14 = arith.constant 0 : index
      %c0_15 = arith.constant 0 : index
      %16 = vector.load %arg6[%c0_14, %c0_15] : memref<8x128xf32, #tpu.memory_space<vmem>>, vector<8x128xf32>
      tpu.vector_store %arg6[%c0_14, %c0_15], %15 {strides = array<i32>} : memref<8x128xf32, #tpu.memory_space<vmem>>, vector<8x128xf32>,
    } else {
    }
    return
  }
  func.func @transform_0(%arg0: i32, %arg1: i32, %arg2: i32) -> (i32, i32) {
    %c0_i32 = arith.constant 0 : i32
    return %arg0, %arg2 : i32, i32
  }
  func.func @transform_1(%arg0: i32, %arg1: i32, %arg2: i32) -> (i32, i32) {
    %c0_i32 = arith.constant 0 : i32
    return %arg2, %arg1 : i32, i32
  }
  func.func @transform_2(%arg0: i32, %arg1: i32, %arg2: i32) -> (i32, i32) {
    %c0_i32 = arith.constant 0 : i32
    %c0_i32_0 = arith.constant 0 : i32
    return %c0_i32, %arg1 : i32, i32
  }
  func.func @transform_3(%arg0: i32, %arg1: i32, %arg2: i32) -> (i32, i32) {
    %c0_i32 = arith.constant 0 : i32
    return %arg0, %arg1 : i32, i32
  }
}

</mosaic_0001>

<bundles_post_ra>
// kernel: tpu_custom_call.1
= control target key start
LH: loop header
LB: loop body
LE: loop exit
PB: predicated region body
PF: predicated region fallthrough
CT: control target
= control target key end

     0   :  { %8 = vsyncpa [#allocation4], 0  ;;  %s342_s0 = inlined_call_operand.hbm [shape: bf16[8,128], index: 0, kind: input, shape index: {}]   ;;  %s343_s1 = inlined_call_operand.hbm [shape: bf16[128,128], index: 1, kind: input, shape index: {}]   ;;  %s344_s2 = inlined_call_operand.vmem [shape: f32[1,128], index: 2, kind: input, shape index: {}]   ;;  %s345_s3 = inlined_call_operand.hbm [shape: f32[8,128], index: 3, kind: output, shape index: {}]  }
   0x1   :  { %9 = vsyncpa [#allocation7], 0 }
   0x2   :  { %10 = vsyncpa [#allocation5], 0  ;;  %s303_s12 = smov [#allocation3]   ;;  %s304_s14 = smov [#allocation6]  }
   0x3   :  { %s17_s13 = sshll.u32 %s303_s12, 4  ;;  %s26_s15 = sshll.u32 %s304_s14, 4  ;;  %s18_s13 = int_to_ptr.vmem [resolvable:$true] %s17_s13  ;;  %s27_s15 = int_to_ptr.vmem [resolvable:$true] %s26_s15 }
   0x4   :  { %s245_s16 = scalar_lea.vmem %s18_s13, 64  ;;  %p250_p1 = scmp.lt.s32.totalorder %s18_s13, %s18_s13 }
   0x5   :  { %p246_p0 = scmp.ne.s32.totalorder %s18_s13, %s245_s16  ;;  %p251_p2 = scmp.lt.s32.totalorder %s245_s16, %s245_s16 }
   0x7   :  { %p252_p3 = por %p251_p2, %p250_p1 }
   0x9   :  { %p253_p4 = pnand %p252_p3, %p246_p0 }
   0xb   :  { %256 = shalt.err (!%p253_p4)
}
   0xc   :  { %20 = dma.hbm_to_vmem [thread:$0]  %s342_s0, 64, %s18_s13, [#allocation4]  }
   0xd   :  { %s265_s19 = scalar_lea.vmem %s27_s15, 1024  ;;  %p270_p6 = scmp.lt.s32.totalorder %s27_s15, %s27_s15 }
   0xe   :  { %p266_p5 = scmp.ne.s32.totalorder %s27_s15, %s265_s19  ;;  %p271_p7 = scmp.lt.s32.totalorder %s265_s19, %s265_s19 }
  0x10   :  { %p272_p8 = por %p271_p7, %p270_p6 }
  0x12   :  { %p273_p9 = pnand %p272_p8, %p266_p5 }
  0x14   :  { %276 = shalt.err (!%p273_p9)
}
  0x15   :  { %s305_s20 = smov 64   ;;  %s306_s21 = smov 4  }
  0x16   :  { %32 = dma.hbm_to_vmem [thread:$0]  %s343_s1, 1024, %s27_s15, [#allocation7], %s305_s20, %s305_s20, %s306_s21  }
  0x17   :  { %297 = dma.done.wait [#allocation4], 64  }
  0x18   :  { %298 = vsyncadd [#allocation4], 4294967232 }
  0x19   :  { %299 = dma.done.wait [#allocation7], 1024  }
  0x1a   :  { %300 = vsyncadd [#allocation7], 4294966272  ;;  %v307_v0 = vmov 0.0   ;;  %vm308_vm0 = vmmov 0   ;;  %v229_v1 = vld [vmem:[#allocation6 + $0x38] sm:$0xff]   ;;  %v230_v2 = vld [vmem:[#allocation6 + $0x30] sm:$0xff]  }
  0x1b   :  { %202 = vmatprep.subr.bf16.mxu0 %v307_v0  ;;  %218 = vmatprep.mubr.msk.bf16.mxu0 %vm308_vm0, %v307_v0  ;;  %v231_v3 = vld [vmem:[#allocation6 + $0x28] sm:$0xff]   ;;  %v232_v4 = vld [vmem:[#allocation6 + $0x20] sm:$0xff]   ;;  %v233_v5 = vld [vmem:[#allocation6 + $0x18] sm:$0xff]   ;;  %s309_s24 = smov [#allocation8]  }
  0x1c   :  { %203 = vmatpush3.bf16.msra.mxu0 %v229_v1  ;;  %v234_v6 = vld [vmem:[#allocation6 + $0x10] sm:$0xff]   ;;  %v235_v7 = vld [vmem:[#allocation6 + $0x8] sm:$0xff]   ;;  %v236_v8 = vld [vmem:[#allocation6] sm:$0xff]   ;;  %s174_s25 = sshll.u32 %s309_s24, 4  ;;  %s175_s25 = int_to_ptr.vmem [resolvable:$true] %s174_s25 }
  0x1d   :  { %204 = vmatprep.subr.bf16.mxu0 %v307_v0  ;;  %v48_v9 = vld [vmem:[#allocation3] sm:$0xf]  ;;  %s277_s26 = scalar_lea.vmem %s175_s25, 128  ;;  %p282_p11 = scmp.lt.s32.totalorder %s175_s25, %s175_s25 }
  0x1e   :  { %v192_v10 = vld [vmem:[%s344_s2] ss:$0 sm:$0xff]  ;;  %p278_p10 = scmp.ne.s32.totalorder %s175_s25, %s277_s26  ;;  %p283_p12 = scmp.lt.s32.totalorder %s277_s26, %s277_s26 }
  0x20   :  { %205 = vmatpush3.bf16.msra.mxu0 %v230_v2  ;;  %p284_p13 = por %p283_p12, %p282_p11 }
  0x21   :  { %206 = vmatprep.subr.bf16.mxu0 %v307_v0 }
  0x22   :  { %p285_p0 = pnand %p284_p13, %p278_p10 }
  0x24   :  { %207 = vmatpush3.bf16.msra.mxu0 %v231_v3 }
  0x25   :  { %208 = vmatprep.subr.bf16.mxu0 %v307_v0 }
  0x28   :  { %209 = vmatpush3.bf16.msra.mxu0 %v232_v4 }
  0x29   :  { %210 = vmatprep.subr.bf16.mxu0 %v307_v0 }
  0x2c   :  { %211 = vmatpush3.bf16.msra.mxu0 %v233_v5 }
  0x2d   :  { %212 = vmatprep.subr.bf16.mxu0 %v307_v0 }
  0x30   :  { %213 = vmatpush3.bf16.msra.mxu0 %v234_v6 }
  0x31   :  { %214 = vmatprep.subr.bf16.mxu0 %v307_v0 }
  0x34   :  { %215 = vmatpush3.bf16.msra.mxu0 %v235_v7 }
  0x35   :  { %216 = vmatprep.subr.bf16.mxu0 %v307_v0 }
  0x38   :  { %217 = vmatpush3.bf16.msra.mxu0 %v236_v8 }
  0x3b   :  { %219 = vmatmul.mubr.bf16.vlgmr.msra.gmra.mxu0 %v48_v9 }
  0xfb   :  { %v147_v11 = vpop.f32.mrf.mxu0 }
  0xfc   :  { %v166_v12 = vadd.f32 %v192_v10, %v147_v11 }
  0xfd   :  { %v220_v13 = vpop.f32.mrf.mxu0 }
  0xfe   :  { %167 = vst [vmem:[#allocation8] sm:$0xff] %v166_v12 }
  0xff   :  { %v150_v14 = vpop.f32.mrf.mxu0 }
 0x100   :  { %288 = shalt.err (!%p285_p0)
}
 0x101   :  { %177 = dma.vmem_to_hbm [thread:$0]  %s175_s25, 128, %s345_s3, [#allocation5]   ;;  %v221_v15 = vpop.f32.mrf.mxu0 }
 0x102   :  { %301 = dma.done.wait [#allocation5], 128  }
 0x103   :  { %302 = vsyncadd [#allocation5], 4294967168 }
 0x104   :  { %181 = vsyncpa [#allocation4], 1 }
 0x105   :  { %182 = vsyncpa [#allocation7], 1 }
 0x106   :  { %183 = vsyncpa [#allocation5], 1 }

</bundles_post_ra>
